<compile_context>
chip_gen: v6e
topology: v6e:2x2x1
jax: 0.10.0
libtpu: 0.0.40
codegen_flags: <defaults>
</compile_context>

<pallas_src>
import functools
import math

import jax
import jax.numpy as jnp
from jax import lax
from jax.experimental import pallas as pl
from jax.experimental.pallas import tpu as pltpu


def _pick_tile(n, target):
    """Largest multiple-of-8 divisor of n that is <= target (or n itself)."""
    if n <= target:
        return n
    t = (target // 8) * 8
    while t >= 8:
        if n % t == 0:
            return t
        t -= 8
    return n


# --------------------------------------------------------------------------
# Pass 1: per-batch Linformer-compressed K^T (d, kf) and V (kf, d).
# --------------------------------------------------------------------------
def _linformer_kv_kernel(x_ref, pk_ref, pv_ref, wkv_ref, kt_ref, v_ref,
                         xk_acc, xv_acc):
    d = x_ref.shape[2]

    @pl.when(pl.program_id(1) == 0)
    def _():
        xk_acc[...] = jnp.zeros_like(xk_acc)
        xv_acc[...] = jnp.zeros_like(xv_acc)

    x = x_ref[0]                                                    # (TK, d) bf16
    # Hoisted sequence-length projection, accumulated over n-tiles. proj_* are
    # pre-transposed to (kf, n) so these are plain NN matmuls.
    xk_acc[...] += jnp.dot(pk_ref[...], x, preferred_element_type=jnp.float32)
    xv_acc[...] += jnp.dot(pv_ref[...], x, preferred_element_type=jnp.float32)

    @pl.when(pl.program_id(1) == pl.num_programs(1) - 1)
    def _():
        xk = xk_acc[...].astype(jnp.bfloat16)                       # (kf, d)
        xv = xv_acc[...].astype(jnp.bfloat16)                       # (kf, d)
        wk = wkv_ref[:, :d]                                         # (d, d)
        wv = wkv_ref[:, d:]                                         # (d, d)
        # Emit K already transposed: kT[do, kf] = sum_di wk[di, do] * xk[kf, di]
        # so pass 2's per-head score matmul is a plain NN matmul.
        kt = lax.dot_general(wk, xk, (((0,), (1,)), ((), ())),
                             preferred_element_type=jnp.float32)    # (d, kf)
        v = jnp.dot(xv, wv, preferred_element_type=jnp.float32)     # (kf, d)
        kt_ref[0] = kt.astype(kt_ref.dtype)
        v_ref[0] = v.astype(v_ref.dtype)


# --------------------------------------------------------------------------
# Pass 2: per (batch, query-tile) attention + output projection.
# --------------------------------------------------------------------------
def _linformer_attn_kernel(x_ref, kt_ref, v_ref, wq_ref, wp_ref, b_ref,
                           o_ref, slab_ref, *, scale, num_heads):
    d = x_ref.shape[2]
    dh = d // num_heads

    x = x_ref[0]                                                    # (TQ, d) bf16
    # Full-width Q projection (contraction over d, lane-dense); cast early.
    q = (scale * jnp.dot(x, wq_ref[...],
                         preferred_element_type=jnp.float32)
         ).astype(jnp.bfloat16)                                     # (TQ, d)
    kt = kt_ref[0]                                                  # (d, kf) bf16
    v = v_ref[0]                                                    # (kf, d) bf16

    # Per-head attention; num_heads is static so the loop is fully unrolled.
    # Heads are grouped so each slab store covers >= 128 lanes when dh < 128
    # (unmasked vst; v5e has a single vector-store slot).
    hpg = math.gcd(num_heads, max(1, 128 // dh))
    for g0 in range(0, num_heads, hpg):
        outs = []
        for hi in range(g0, g0 + hpg):
            sl = slice(hi * dh, (hi + 1) * dh)
            s = jnp.dot(q[:, sl], kt[sl, :],
                        preferred_element_type=jnp.float32)         # (TQ, kf)
            s = s - jnp.max(s, axis=-1, keepdims=True)              # f32
            p = jnp.exp(s)                                          # f32
            inv = pl.reciprocal(jnp.sum(p, axis=-1, keepdims=True),
                                approx=True)                        # EUP, (TQ,1)
            oh = jnp.dot(p.astype(jnp.bfloat16), v[:, sl],
                         preferred_element_type=jnp.float32)        # (TQ, dh)
            outs.append((oh * inv).astype(jnp.bfloat16))
        grp = outs[0] if len(outs) == 1 else jnp.concatenate(outs, axis=-1)
        slab_ref[:, g0 * dh:(g0 + hpg) * dh] = grp

    # Single full-d output projection + bias from the lane-dense slab, one
    # store of the output block.
    out = jnp.dot(slab_ref[...], wp_ref[...],
                  preferred_element_type=jnp.float32)               # (TQ, d)
    o_ref[0] = (out + b_ref[...]).astype(o_ref.dtype)


def linformer_self_attention(x, wq_t, wkv_t, proj_k, proj_v, wp_t, bp, *,
                             num_heads, scale, out_dtype=jnp.float32,
                             q_tile=512, k_tile=512):
    """Linformer self-attention forward (dropout p = 0).

    Linear weights are stored pre-transposed as (in_features, out_features);
    proj_k / proj_v in the module's native (seq_len, num_feats) layout.
    Pass out_dtype=jnp.bfloat16 to halve the output HBM writeback if the
    consumer allows it.
    """
    b, n, d = x.shape
    kf = proj_k.shape[1]
    assert d % num_heads == 0

    tq = _pick_tile(n, q_tile)
    tk = _pick_tile(n, k_tile)
    nq = n // tq
    nk = n // tk

    cdt = jnp.bfloat16
    x_b = x.astype(cdt)
    pk_t = proj_k.T.astype(cdt)          # (kf, n): lane-dense, one-time host transpose
    pv_t = proj_v.T.astype(cdt)
    wq_b = wq_t.astype(cdt)
    wkv_b = wkv_t.astype(cdt)
    wp_b = wp_t.astype(cdt)
    bias = bp.reshape(1, d).astype(jnp.float32)

    resident = pl.Buffered(1)            # constant-index blocks: single buffer

    # ---- pass 1: Linformer-compressed K^T / V, reducing over n-tiles -----
    kt, v = pl.pallas_call(
        _linformer_kv_kernel,
        out_shape=(jax.ShapeDtypeStruct((b, d, kf), cdt),
                   jax.ShapeDtypeStruct((b, kf, d), cdt)),
        grid_spec=pltpu.PrefetchScalarGridSpec(
            num_scalar_prefetch=0,
            grid=(b, nk),
            in_specs=[
                pl.BlockSpec((1, tk, d), lambda bi, ki: (bi, ki, 0)),      # x
                pl.BlockSpec((kf, tk), lambda bi, ki: (0, ki)),            # P_k^T
                pl.BlockSpec((kf, tk), lambda bi, ki: (0, ki)),            # P_v^T
                pl.BlockSpec((d, 2 * d), lambda bi, ki: (0, 0),
                             pipeline_mode=resident),                      # Wkv
            ],
            out_specs=(
                pl.BlockSpec((1, d, kf), lambda bi, ki: (bi, 0, 0)),       # K^T
                pl.BlockSpec((1, kf, d), lambda bi, ki: (bi, 0, 0)),       # V
            ),
            scratch_shapes=[pltpu.VMEM((kf, d), jnp.float32),
                            pltpu.VMEM((kf, d), jnp.float32)]),
        compiler_params=pltpu.CompilerParams(
            dimension_semantics=("parallel", "arbitrary")),
    )(x_b, pk_t, pv_t, wkv_b)

    # ---- pass 2: attention + output projection, tiled over queries -------
    out = pl.pallas_call(
        functools.partial(_linformer_attn_kernel, scale=scale,
                          num_heads=num_heads),
        out_shape=jax.ShapeDtypeStruct((b, n, d), out_dtype),
        grid_spec=pltpu.PrefetchScalarGridSpec(
            num_scalar_prefetch=0,
            grid=(b, nq),
            in_specs=[
                pl.BlockSpec((1, tq, d), lambda bi, qi: (bi, qi, 0)),      # x
                pl.BlockSpec((1, d, kf), lambda bi, qi: (bi, 0, 0)),       # K^T
                pl.BlockSpec((1, kf, d), lambda bi, qi: (bi, 0, 0)),       # V
                pl.BlockSpec((d, d), lambda bi, qi: (0, 0),
                             pipeline_mode=resident),                      # Wq
                pl.BlockSpec((d, d), lambda bi, qi: (0, 0),
                             pipeline_mode=resident),                      # Wp
                pl.BlockSpec((1, d), lambda bi, qi: (0, 0),
                             pipeline_mode=resident),                      # bias
            ],
            out_specs=pl.BlockSpec((1, tq, d), lambda bi, qi: (bi, qi, 0)),
            scratch_shapes=[pltpu.VMEM((tq, d), cdt)]),                    # head slab
        compiler_params=pltpu.CompilerParams(
            dimension_semantics=("parallel", "parallel")),
    )(x_b, kt, v, wq_b, wp_b, bias)

    return out


def linformer_reference(x, wq_t, wkv_t, proj_k, proj_v, wp_t, bp,
                        *, num_heads, scale):
    """Pure-JAX f32 mirror of the PyTorch forward pass."""
    b, n, d = x.shape
    h = num_heads
    dh = d // h
    kf = proj_k.shape[1]

    q = (scale * (x @ wq_t)).reshape(b, n, h, dh).transpose(0, 2, 1, 3)
    kv = x @ wkv_t
    keys, values = kv[..., :d], kv[..., d:]
    keys = jnp.einsum('bnd,nk->bkd', keys, proj_k)
    values = jnp.einsum('bnd,nk->bkd', values, proj_v)
    keys = keys.reshape(b, kf, h, dh).transpose(0, 2, 1, 3)
    values = values.reshape(b, kf, h, dh).transpose(0, 2, 1, 3)
    attn = jnp.einsum('bhnd,bhkd->bhnk', q, keys)
    attn = jax.nn.softmax(attn - jnp.max(attn, axis=-1, keepdims=True), axis=-1)
    out = jnp.einsum('bhnk,bhkd->bhnd', attn, values)
    out = out.transpose(0, 2, 1, 3).reshape(b, n, d)
    return out @ wp_t + bp


if __name__ == "__main__":
    # small, module-consistent shapes
    B, N, D = 2, 8, 32          # batch, seq_len, dim
    H = 8                       # num_heads
    KF = 16                     # num_feats
    DH = D // H
    SCALE = DH ** (-0.5)        # qk_scale=None -> head_dim**-0.5

    key = jax.random.PRNGKey(0)
    ks = jax.random.split(key, 8)

    std_d = 1.0 / math.sqrt(D)
    std_kf = 1.0 / math.sqrt(KF)

    wq_t = jax.random.uniform(ks[0], (D, D), jnp.float32, -std_d, std_d)
    wkv_t = jax.random.uniform(ks[1], (D, 2 * D), jnp.float32, -std_d, std_d)
    wp_t = jax.random.uniform(ks[2], (D, D), jnp.float32, -std_d, std_d)
    bp = jax.random.uniform(ks[3], (D,), jnp.float32, -std_d, std_d)
    proj_k = jax.random.uniform(ks[4], (N, KF), jnp.float32, -std_kf, std_kf)
    proj_v = jax.random.uniform(ks[5], (N, KF), jnp.float32, -std_kf, std_kf)
    x = jax.random.normal(ks[6], (B, N, D), jnp.float32)

    out = linformer_self_attention(
        x, wq_t, wkv_t, proj_k, proj_v, wp_t, bp, num_heads=H, scale=SCALE)
    out = jax.block_until_ready(out)

    ref = linformer_reference(
        x, wq_t, wkv_t, proj_k, proj_v, wp_t, bp, num_heads=H, scale=SCALE)
    ref = jax.block_until_ready(ref)

    assert out.shape == (B, N, D)
    # bf16 MXU operands / approx EUP reciprocal (f32 accumulation) vs the
    # pure-f32 reference: expected deviation O(1e-3); 2e-2 gives margin.
    max_err = jnp.max(jnp.abs(out - ref))
    assert jnp.allclose(out, ref, atol=2e-2, rtol=2e-2), (
        f"max abs err {max_err}")

    print("KERNEL_OK")
</pallas_src>

<mosaic_0001>
module attributes {stable_mosaic.version = 11 : i64} {
  func.func @_linformer_kv_kernel(%arg0: i32, %arg1: i32, %arg2: memref<1x8x32xbf16, #tpu.memory_space<vmem>>, %arg3: memref<16x8xbf16, #tpu.memory_space<vmem>>, %arg4: memref<16x8xbf16, #tpu.memory_space<vmem>>, %arg5: memref<32x64xbf16, #tpu.memory_space<vmem>>, %arg6: memref<1x32x16xbf16, #tpu.memory_space<vmem>>, %arg7: memref<1x16x32xbf16, #tpu.memory_space<vmem>>, %arg8: memref<16x32xf32, #tpu.memory_space<vmem>>, %arg9: memref<16x32xf32, #tpu.memory_space<vmem>>) attributes {dimension_semantics = [#tpu.dimension_semantics<parallel>, #tpu.dimension_semantics<arbitrary>], iteration_bounds = array<i64: 2, 1>, scalar_prefetch = 0 : i64, scratch_operands = 2 : i64, tpu.core_type = #tpu.core_type<tc>, window_params = [{transform_indices = @transform_0, window_bounds = array<i64: 1, 8, 32>}, {transform_indices = @transform_1, window_bounds = array<i64: 16, 8>}, {transform_indices = @transform_2, window_bounds = array<i64: 16, 8>}, {pipeline_mode = #tpu.pipeline_mode<synchronous>, transform_indices = @transform_3, window_bounds = array<i64: 32, 64>}, {transform_indices = @transform_4, window_bounds = array<i64: 1, 32, 16>}, {transform_indices = @transform_5, window_bounds = array<i64: 1, 16, 32>}]} {
    %c0_i32 = arith.constant 0 : i32
    %0 = arith.cmpi eq, %arg1, %c0_i32 : i32
    %1 = arith.extui %0 : i1 to i32
    %c0_i32_0 = arith.constant 0 : i32
    %2 = arith.cmpi ne, %1, %c0_i32_0 : i32
    scf.if %2 {
      %cst_18 = arith.constant 0.000000e+00 : f32
      %18 = vector.broadcast %cst_18 : f32 to vector<16x32xf32>
      %c0_19 = arith.constant 0 : index
      %c0_20 = arith.constant 0 : index
      %19 = vector.load %arg8[%c0_19, %c0_20] : memref<16x32xf32, #tpu.memory_space<vmem>>, vector<16x32xf32>
      tpu.vector_store %arg8[%c0_19, %c0_20], %18 {strides = array<i32>} : memref<16x32xf32, #tpu.memory_space<vmem>>, vector<16x32xf32>,
      %cst_21 = arith.constant 0.000000e+00 : f32
      %20 = vector.broadcast %cst_21 : f32 to vector<16x32xf32>
      %c0_22 = arith.constant 0 : index
      %c0_23 = arith.constant 0 : index
      %21 = vector.load %arg9[%c0_22, %c0_23] : memref<16x32xf32, #tpu.memory_space<vmem>>, vector<16x32xf32>
      tpu.vector_store %arg9[%c0_22, %c0_23], %20 {strides = array<i32>} : memref<16x32xf32, #tpu.memory_space<vmem>>, vector<16x32xf32>,
    } else {
    }
    %c0 = arith.constant 0 : index
    %c0_1 = arith.constant 0 : index
    %c0_2 = arith.constant 0 : index
    %3 = vector.load %arg2[%c0, %c0_1, %c0_2] : memref<1x8x32xbf16, #tpu.memory_space<vmem>>, vector<1x8x32xbf16>
    %4 = vector.shape_cast %3 : vector<1x8x32xbf16> to vector<8x32xbf16>
    %c0_3 = arith.constant 0 : index
    %c0_4 = arith.constant 0 : index
    %5 = vector.load %arg8[%c0_3, %c0_4] : memref<16x32xf32, #tpu.memory_space<vmem>>, vector<16x32xf32>
    %c0_5 = arith.constant 0 : index
    %c0_6 = arith.constant 0 : index
    %6 = vector.load %arg3[%c0_5, %c0_6] : memref<16x8xbf16, #tpu.memory_space<vmem>>, vector<16x8xbf16>
    %cst = arith.constant dense<0.000000e+00> : vector<16x32xf32>
    %7 = tpu.matmul %6, %4, %cst {dimension_numbers = #tpu.dot_dimension_numbers<[1], [0], [0], [1], [0, 0, 1, 1], [], []>} : vector<16x8xbf16>, vector<8x32xbf16>, vector<16x32xf32> -> vector<16x32xf32>
    %8 = arith.addf %5, %7 : vector<16x32xf32>
    %c0_7 = arith.constant 0 : index
    %c0_8 = arith.constant 0 : index
    %9 = vector.load %arg8[%c0_7, %c0_8] : memref<16x32xf32, #tpu.memory_space<vmem>>, vector<16x32xf32>
    tpu.vector_store %arg8[%c0_7, %c0_8], %8 {strides = array<i32>} : memref<16x32xf32, #tpu.memory_space<vmem>>, vector<16x32xf32>,
    %c0_9 = arith.constant 0 : index
    %c0_10 = arith.constant 0 : index
    %10 = vector.load %arg9[%c0_9, %c0_10] : memref<16x32xf32, #tpu.memory_space<vmem>>, vector<16x32xf32>
    %c0_11 = arith.constant 0 : index
    %c0_12 = arith.constant 0 : index
    %11 = vector.load %arg4[%c0_11, %c0_12] : memref<16x8xbf16, #tpu.memory_space<vmem>>, vector<16x8xbf16>
    %cst_13 = arith.constant dense<0.000000e+00> : vector<16x32xf32>
    %12 = tpu.matmul %11, %4, %cst_13 {dimension_numbers = #tpu.dot_dimension_numbers<[1], [0], [0], [1], [0, 0, 1, 1], [], []>} : vector<16x8xbf16>, vector<8x32xbf16>, vector<16x32xf32> -> vector<16x32xf32>
    %13 = arith.addf %10, %12 : vector<16x32xf32>
    %c0_14 = arith.constant 0 : index
    %c0_15 = arith.constant 0 : index
    %14 = vector.load %arg9[%c0_14, %c0_15] : memref<16x32xf32, #tpu.memory_space<vmem>>, vector<16x32xf32>
    tpu.vector_store %arg9[%c0_14, %c0_15], %13 {strides = array<i32>} : memref<16x32xf32, #tpu.memory_space<vmem>>, vector<16x32xf32>,
    %c0_i32_16 = arith.constant 0 : i32
    %15 = arith.cmpi eq, %arg1, %c0_i32_16 : i32
    %16 = arith.extui %15 : i1 to i32
    %c0_i32_17 = arith.constant 0 : i32
    %17 = arith.cmpi ne, %16, %c0_i32_17 : i32
    scf.if %17 {
      %c0_18 = arith.constant 0 : index
      %c0_19 = arith.constant 0 : index
      %18 = vector.load %arg8[%c0_18, %c0_19] : memref<16x32xf32, #tpu.memory_space<vmem>>, vector<16x32xf32>
      %19 = arith.truncf %18 : vector<16x32xf32> to vector<16x32xbf16>
      %c0_20 = arith.constant 0 : index
      %c0_21 = arith.constant 0 : index
      %20 = vector.load %arg9[%c0_20, %c0_21] : memref<16x32xf32, #tpu.memory_space<vmem>>, vector<16x32xf32>
      %21 = arith.truncf %20 : vector<16x32xf32> to vector<16x32xbf16>
      %c0_22 = arith.constant 0 : index
      %c0_23 = arith.constant 0 : index
      %22 = vector.load %arg5[%c0_22, %c0_23] : memref<32x64xbf16, #tpu.memory_space<vmem>>, vector<32x32xbf16>
      %c0_24 = arith.constant 0 : index
      %c32 = arith.constant 32 : index
      %23 = vector.load %arg5[%c0_24, %c32] : memref<32x64xbf16, #tpu.memory_space<vmem>>, vector<32x32xbf16>
      %cst_25 = arith.constant dense<0.000000e+00> : vector<32x16xf32>
      %24 = tpu.matmul %22, %19, %cst_25 {dimension_numbers = #tpu.dot_dimension_numbers<[0], [1], [1], [0], [0, 1, 1, 0], [], []>} : vector<32x32xbf16>, vector<16x32xbf16>, vector<32x16xf32> -> vector<32x16xf32>
      %cst_26 = arith.constant dense<0.000000e+00> : vector<16x32xf32>
      %25 = tpu.matmul %21, %23, %cst_26 {dimension_numbers = #tpu.dot_dimension_numbers<[1], [0], [0], [1], [0, 0, 1, 1], [], []>} : vector<16x32xbf16>, vector<32x32xbf16>, vector<16x32xf32> -> vector<16x32xf32>
      %26 = arith.truncf %24 : vector<32x16xf32> to vector<32x16xbf16>
      %c0_27 = arith.constant 0 : index
      %c0_28 = arith.constant 0 : index
      %c0_29 = arith.constant 0 : index
      %27 = vector.load %arg6[%c0_27, %c0_28, %c0_29] : memref<1x32x16xbf16, #tpu.memory_space<vmem>>, vector<1x32x16xbf16>
      %28 = vector.shape_cast %27 : vector<1x32x16xbf16> to vector<32x16xbf16>
      %29 = vector.shape_cast %26 : vector<32x16xbf16> to vector<1x32x16xbf16>
      tpu.vector_store %arg6[%c0_27, %c0_28, %c0_29], %29 {strides = array<i32>} : memref<1x32x16xbf16, #tpu.memory_space<vmem>>, vector<1x32x16xbf16>,
      %30 = arith.truncf %25 : vector<16x32xf32> to vector<16x32xbf16>
      %c0_30 = arith.constant 0 : index
      %c0_31 = arith.constant 0 : index
      %c0_32 = arith.constant 0 : index
      %31 = vector.load %arg7[%c0_30, %c0_31, %c0_32] : memref<1x16x32xbf16, #tpu.memory_space<vmem>>, vector<1x16x32xbf16>
      %32 = vector.shape_cast %31 : vector<1x16x32xbf16> to vector<16x32xbf16>
      %33 = vector.shape_cast %30 : vector<16x32xbf16> to vector<1x16x32xbf16>
      tpu.vector_store %arg7[%c0_30, %c0_31, %c0_32], %33 {strides = array<i32>} : memref<1x16x32xbf16, #tpu.memory_space<vmem>>, vector<1x16x32xbf16>,
    } else {
    }
    return
  }
  func.func @transform_0(%arg0: i32, %arg1: i32) -> (i32, i32, i32) {
    %c0_i32 = arith.constant 0 : i32
    %c0_i32_0 = arith.constant 0 : i32
    return %arg0, %arg1, %c0_i32 : i32, i32, i32
  }
  func.func @transform_1(%arg0: i32, %arg1: i32) -> (i32, i32) {
    %c0_i32 = arith.constant 0 : i32
    %c0_i32_0 = arith.constant 0 : i32
    return %c0_i32, %arg1 : i32, i32
  }
  func.func @transform_2(%arg0: i32, %arg1: i32) -> (i32, i32) {
    %c0_i32 = arith.constant 0 : i32
    %c0_i32_0 = arith.constant 0 : i32
    return %c0_i32, %arg1 : i32, i32
  }
  func.func @transform_3(%arg0: i32, %arg1: i32) -> (i32, i32) {
    %c0_i32 = arith.constant 0 : i32
    %c0_i32_0 = arith.constant 0 : i32
    %c0_i32_1 = arith.constant 0 : i32
    return %c0_i32, %c0_i32_0 : i32, i32
  }
  func.func @transform_4(%arg0: i32, %arg1: i32) -> (i32, i32, i32) {
    %c0_i32 = arith.constant 0 : i32
    %c0_i32_0 = arith.constant 0 : i32
    %c0_i32_1 = arith.constant 0 : i32
    return %arg0, %c0_i32, %c0_i32_0 : i32, i32, i32
  }
  func.func @transform_5(%arg0: i32, %arg1: i32) -> (i32, i32, i32) {
    %c0_i32 = arith.constant 0 : i32
    %c0_i32_0 = arith.constant 0 : i32
    %c0_i32_1 = arith.constant 0 : i32
    return %arg0, %c0_i32, %c0_i32_0 : i32, i32, i32
  }
}

</mosaic_0001>

<bundles_post_ra>
// kernel: tpu_custom_call.1
= control target key start
LH: loop header
LB: loop body
LE: loop exit
PB: predicated region body
PF: predicated region fallthrough
CT: control target
= control target key end

     0   :  { %11 = vsyncpa [#allocation5], 0  ;;  %s1166_s0 = inlined_call_operand.vmem [shape: bf16[2,8,32], index: 0, kind: input, shape index: {}]   ;;  %s1167_s1 = inlined_call_operand.vmem [shape: bf16[16,8], index: 1, kind: input, shape index: {}]   ;;  %s1168_s2 = inlined_call_operand.vmem [shape: bf16[16,8], index: 2, kind: input, shape index: {}]   ;;  %s1169_s3 = inlined_call_operand.vmem [shape: bf16[32,64], index: 3, kind: input, shape index: {}]   ;;  %s1170_s4 = inlined_call_operand.vmem [shape: bf16[2,32,16], index: 4, kind: output, shape index: {0}]   ;;  %s1171_s5 = inlined_call_operand.hbm [shape: bf16[2,16,32], index: 5, kind: output, shape index: {1}]  }
   0x1   :  { %13 = vsyncpa [#allocation5 + $0x1], 0  ;;  %s1007_s18 = smov 0   ;;  %s1009_s19 = smov 0  }
   0x2   :  { %s1011_s20 = smov 0   ;;  %s1013_s21 = smov 0  }
   0x3   :  { %s1015_s22 = smov 0   ;;  %s1017_s23 = smov 0  }
   0x4 LB: > { %s752_s24 = sadd.s32 4294967295, %s969_s23   ;;  %s753_s25 = sadd.s32 4294967294, %s969_s23   ;;  %s969_s23 = sphi %s1017_s23, %s19_s23   ;;  %s965_s22 = sphi %s1015_s22, %s1178_s22   ;;  %s961_s21 = sphi %s1013_s21, %s1177_s21   ;;  %s957_s20 = sphi %s1011_s20, %s1176_s20   ;;  %s953_s19 = sphi %s1009_s19, %s1175_s19   ;;  %s949_s18 = sphi %s1007_s18, %s1174_s18  }
   0x5   : > { %s31_s26 = sadd.s32 1, %s965_s22  ;;  %s165_s27 = sadd.s32 1, %s957_s20 }
   0x6   : > { %p33_p0 = scmp.ge.s32.totalorder %s31_s26, 2  ;;  %p175_p1 = scmp.ne.s32.totalorder %s957_s20, %s953_s19 }
   0x7   : > { %p176_p2 = scmp.eq.s32.totalorder %s752_s24, 1  ;;  %p181_p3 = scmp.ne.s32.totalorder %s953_s19, %s949_s18 }
   0x8   : > { %s1180_s26 = smov (%p33_p0, %s31_s26), 0  ;;  %p182_p5 = scmp.eq.s32.totalorder %s753_s25, 1 }
   0x9   : > { %p1047_p4 = por %p176_p2, %p175_p1  ;;  %s162_s29 = ssub.s32 %s965_s22, %s1180_s26 }
   0xa   : > { %p758_p6 = scmp.ge.s32.totalorder %s969_s23, 1  ;;  %p163_p7 = scmp.eq.s32.totalorder %s162_s29, 0 }
   0xb   : > { %p1054_p8 = por %p182_p5, %p181_p3  ;;  %p227_p9 = scmp.lt.s32.totalorder %s969_s23, 3 }
   0xc   : > { %s1060_s6 = scalar_select %p163_p7, %s957_s20, %s165_s27  }
   0xd   : > { %p228_p10 = pnand %p758_p6, %p227_p9 }
   0xe   : > { %p270_p11 = scmp.lt.s32.totalorder (!%p228_p10), %s961_s21, 1  ;;  %s973_s16 = smov (!%p228_p10), 96  }
   0xf   : > { %231 = sbr.rel (%p228_p10) target bundleno = 458 (0x1ca), region = 36  ;;  %s267_s29 = sand.u32 (!%p228_p10), 1, %s953_s19  }
  0x10   : > { %s759_s8 = sshll.u32 (!%p228_p10), %s267_s29, 3  ;;  %s790_s11 = sshll.u32 (!%p228_p10), %s961_s21, 7 }
  0x11   : > { %s269_s9 = scalar_lea.vmem (!%p228_p10), [#allocation4], %s759_s8  ;;  %s974_s25 = smov (!%p228_p10), [#allocation4]  }
  0x12   : > { %s897_s27 = sshll.u32 (!%p228_p10), %s974_s25, 4  ;;  %s898_s27 = int_to_ptr.vmem [resolvable:$false] %s897_s27 }
  0x13   : > { %s899_s8 = scalar_lea.vmem (!%p228_p10), %s898_s27, 256 }
  0x14   : > { %v971_v0 = vmov 0.0   ;;  %s1064_s7 = scalar_select %p270_p11, %s961_s21, 1  ;;  %vm972_vm0 = vmmov 0   ;;  %v891_v1 = vld [vmem:[%s1169_s3 + $0x8] sm:$0xff]   ;;  %vm314_vm1 = vcmask 1043456   ;;  %v892_v2 = vld [vmem:[%s1169_s3] sm:$0xff]  }
  0x15   : > { %801 = vmatprep.subr.bf16.mxu0 %v971_v0  ;;  %807 = vmatprep.subr.bf16.mxu1 %v971_v0  ;;  %vm295_vm2 = vcmask 261120   ;;  %v889_v5 = vld [vmem:[%s1167_s1] sm:$0xff]   ;;  %vm310_vm3 = vcmask 64512   ;;  %vm599_vm4 = vcmask 257024   ;;  %vm586_vm5 = vcmask 125952  }
  0x16   : > { %803 = vmatprep.mubr.msk.bf16.mxu0 %vm972_vm0, %v971_v0  ;;  %809 = vmatprep.mubr.msk.bf16.mxu1 %vm972_vm0, %v971_v0  ;;  %s760_s10 = sshll.u32 %s1064_s7, 2  ;;  %296 = vst.msk [vmem:[#allocation2] sm:$0xff] %vm295_vm2, %v971_v0  ;;  %297 = vst.msk [vmem:[#allocation2 + $0x8] sm:$0xff] %vm295_vm2, %v971_v0  ;;  %v890_v6 = vld [vmem:[%s1168_s2] sm:$0xff]   ;;  %s783_s12 = sshll.u32 %s1064_s7, 4 }
  0x17   : > { %s276_s15 = scalar_lea.vmem %s1166_s0, %s760_s10  ;;  %522 = vrot.lane.b32.xlu0 %v891_v1, %s973_s16  ;;  %298 = vst.msk [vmem:[#allocation3] sm:$0xff] %vm295_vm2, %v971_v0  ;;  %299 = vst.msk [vmem:[#allocation3 + $0x8] sm:$0xff] %vm295_vm2, %v971_v0  ;;  %446 = vxpose.xlu1.c.b16.start [1/2] (short) (narrow) %v892_v2, 32  ;;  %s624_s10 = sshll.u32 %s269_s9, 4  ;;  %s1101_s10 = int_to_ptr.vmem [resolvable:$true] %s624_s10 }
  0x18   : > { %v300_v3 = vld [vmem:[%s276_s15] sm:$0xf]  ;;  %s1106_s15 = scalar_lea.hbm %s1171_s5, %s790_s11  ;;  %s1111_s21 = scalar_lea.vmem %s1170_s4, %s783_s12 }
  0x19   : > { %v316_v4 = vsel %vm314_vm1, %v300_v3, 0  ;;  %s1113_s7 = scalar_lea.sflag [#allocation5], %s267_s29  ;;  %s893_s24 = scalar_lea.vmem %s1101_s10, 128 }
  0x1a   : > { %802 = vmatpush3.bf16.msra.mxu0 %v316_v4  ;;  %808 = vmatpush3.bf16.msra.mxu1 %v316_v4  ;;  %p894_p12 = scmp.ne.s32.totalorder %s1101_s10, %s893_s24  ;;  %p900_p1 = scmp.lt.s32.totalorder %s1101_s10, %s898_s27 }
  0x1b   : > { %520 = vrot.lane.b32.xlu0 %v892_v2, %s973_s16  ;;  %819 = vmatprep.subr.bf16.mxu1 %v971_v0  ;;  %p901_p2 = scmp.lt.s32.totalorder %s899_s8, %s893_s24 }
  0x1c   : > { %447 = vxpose.xlu1.c.b16.end [2/2] (short) (narrow) %v891_v1, 32  ;;  %p895_p13 = pnand %p894_p12, %p1047_p4 }
  0x1d   : > { %804 = vmatmul.mubr.msk.bf16.vlgmr.msra.gmra.mxu0 %vm310_vm3, %v889_v5  ;;  %810 = vmatmul.mubr.msk.bf16.vlgmr.msra.gmra.mxu1 %vm310_vm3, %v890_v6  ;;  %v301_v10 = vld [vmem:[#allocation2] sm:$0xff]  ;;  %v302_v18 = vld [vmem:[#allocation2 + $0x8] sm:$0xff]  ;;  %p902_p3 = por %p901_p2, %p900_p1 }
  0x1e   : > { %823 = vmatprep.mubr.msk.bf16.mxu1 %vm972_vm0, %v971_v0  ;;  %v364_v11 = vld [vmem:[#allocation3] sm:$0xff]  ;;  %v365_v19 = vld [vmem:[#allocation3 + $0x8] sm:$0xff]  ;;  %p896_p0 = pneg %p895_p13 }
  0x20   : > { %p903_p5 = pnand %p902_p3, %p896_p0 }
  0x7a   : > { %v454_v7 = vpop.trf.xlu1 }
  0x7b   : > { %815 = vmatprep.mubr.msk.bf16.mxu0 %vm295_vm2, %v454_v7 }
  0x7e   : > { %v455_v33 = vpop.trf.xlu1 }
  0x89   : > { %v523_v8 = vpop.permute.xlu0 %522 }
  0x8a   : > { %820 = vmatpush3.bf16.msra.mxu1 %v523_v8 }
  0x8b   : > { %821 = vmatprep.subr.bf16.mxu1 %v971_v0 }
  0x8d   : > { %v521_v9 = vpop.permute.xlu0 %520 }
  0x8e   : > { %822 = vmatpush3.bf16.msra.mxu1 %v521_v9 }
  0xdd   : > { %v352_v12 = vpop.f32.mrf.mxu0  ;;  %v410_v13 = vpop.f32.mrf.mxu1 }
  0xde   : > { %v359_v14 = vadd.f32 %v352_v12, %v301_v10  ;;  %v417_v15 = vadd.f32 %v410_v13, %v364_v11 }
  0xdf   : > { %v805_v16 = vpop.f32.mrf.mxu0  ;;  %v811_v17 = vpop.f32.mrf.mxu1 }
  0xe0   : > { %362 = vst.msk [vmem:[#allocation2] sm:$0xff] %vm295_vm2, %v359_v14  ;;  %419 = vst.msk [vmem:[#allocation3] sm:$0xff] %vm295_vm2, %v417_v15 }
  0xe1   : > { %v355_v20 = vpop.f32.mrf.mxu0  ;;  %v413_v21 = vpop.f32.mrf.mxu1 }
  0xe2   : > { %v360_v22 = vadd.f32 %v355_v20, %v302_v18  ;;  %v418_v23 = vadd.f32 %v413_v21, %v365_v19 }
  0xe3   : > { %v806_v24 = vpop.f32.mrf.mxu0  ;;  %v812_v25 = vpop.f32.mrf.mxu1 }
  0xe4   : > { %363 = vst.msk [vmem:[#allocation2 + $0x8] sm:$0xff] %vm295_vm2, %v360_v22  ;;  %420 = vst.msk [vmem:[#allocation3 + $0x8] sm:$0xff] %vm295_vm2, %v418_v23 }
  0xe7   : > { %v427_v26 = vld [vmem:[#allocation3] sm:$0xff]  ;;  %v424_v27 = vld [vmem:[#allocation2] sm:$0xff] }
  0xeb   : > { %v425_v28 = vld [vmem:[#allocation2 + $0x8] sm:$0xff]  ;;  %v428_v29 = vld [vmem:[#allocation3 + $0x8] sm:$0xff] }
  0xec   : > { %v426_v30 = vpack.c.bf16 %v425_v28, %v424_v27  ;;  %v429_v31 = vpack.c.bf16 %v428_v29, %v427_v26 }
  0xee   : > { %827 = vmatprep.subr.msk.bf16.mxu0 %vm295_vm2, %v426_v30  ;;  %824 = vmatmul.mubr.msk.bf16.vlgmr.msra.gmra.mxu1 %vm295_vm2, %v429_v31  ;;  %v469_v32 = vsel %vm295_vm2, %v426_v30, 0 }
  0xef   : > { %814 = vmatpush3.bf16.xpose.msra.mxu0 %v469_v32 }
  0xf6   : > { %816 = vmatmul.mubr.msk.bf16.vlgmr.msra.gmra.mxu0 %vm295_vm2, %v455_v33 }
 0x1ae   : > { %v563_v34 = vpop.f32.mrf.mxu1 }
 0x1af   : > { %v788_v35 = vpack.c.bf16 %v563_v34, %v563_v34 }
 0x1b0   : > { %v825_v36 = vpop.f32.mrf.mxu1 }
 0x1b1   : > { %600 = vst.msk [vmem:[%s269_s9] sm:$0xf] %vm599_vm4, %v788_v35 }
 0x1b2   : > { %v566_v37 = vpop.f32.mrf.mxu1 }
 0x1b3   : > { %v789_v38 = vpack.c.bf16 %v566_v37, %v566_v37 }
 0x1b4   : > { %v826_v39 = vpop.f32.mrf.mxu1 }
 0x1b5   : > { %601 = vst.msk [vmem:[%s269_s9 + $0x4] sm:$0xf] %vm599_vm4, %v789_v38 }
 0x1b6   : > { %v817_v40 = vpop.f32.mrf.mxu0 }
 0x1b7   : > { %906 = shalt.err (!%p903_p5)
}
 0x1b8   : > { %s907_s29 = scalar_lea.hbm %s1106_s15, 128  ;;  %s911_s12 = scalar_lea.hbm %s1171_s5, 256 }
 0x1b9   : > { %p908_p6 = scmp.ne.s32.totalorder %s1106_s15, %s907_s29  ;;  %p912_p10 = scmp.lt.s32.totalorder %s1106_s15, %s1171_s5 }
 0x1ba   : > { %p913_p11 = scmp.lt.s32.totalorder %s911_s12, %s907_s29 }
 0x1bb   : > { %p909_p7 = pnand %p908_p6, %p1047_p4 }
 0x1bc   : > { %p914_p12 = por %p913_p11, %p912_p10 }
 0x1bd   : > { %p910_p9 = pneg %p909_p7 }
 0x1bf   : > { %p915_p13 = pnand %p914_p12, %p910_p9 }
 0x1c1   : > { %918 = shalt.err (!%p915_p13)
}
 0x1c2   : > { %s975_s16 = smov 64   ;;  %s976_s17 = smov 4   ;;  %v786_v41 = vpack.c.bf16 %v817_v40, %v817_v40  ;;  %v505_v42 = vpop.f32.mrf.mxu0 }
 0x1c3   : > { %828 = dma.vmem_to_hbm [thread:$0]  (%p1047_p4), %s1101_s10, 128, %s1106_s15, %s1113_s7, %s975_s16, %s975_s16, %s976_s17   ;;  %v784_v43 = vpack.c.bf16 %v505_v42, %v505_v42 }
 0x1c4   : > { %589 = vst.msk [vmem:[%s1111_s21 + $0x8] sm:$0xf] %vm586_vm5, %v786_v41  ;;  %v818_v44 = vpop.f32.mrf.mxu0 }
 0x1c5   : > { %587 = vst.msk [vmem:[%s1111_s21] sm:$0xf] %vm586_vm5, %v784_v43  ;;  %v787_v45 = vpack.c.bf16 %v818_v44, %v818_v44 }
 0x1c6   : > { %v508_v46 = vpop.f32.mrf.mxu0 }
 0x1c7   : > { %590 = vst.msk [vmem:[%s1111_s21 + $0xc] sm:$0xf] %vm586_vm5, %v787_v45  ;;  %v785_v47 = vpack.c.bf16 %v508_v46, %v508_v46 }
 0x1c9   : > { %588 = vst.msk [vmem:[%s1111_s21 + $0x4] sm:$0xf] %vm586_vm5, %v785_v47 }
 0x1ca PF: > { %p834_p4 = scmp.ge.s32.totalorder %s969_s23, 2  ;;  %s647_s28 = sand.u32 1, %s949_s18  }
 0x1cb   : > { %s648_s10 = scalar_lea.sflag [#allocation5], %s647_s28 }
 0x1cc   : > { %p831_p0 = pnand %p834_p4, %p1054_p8 }
 0x1ce   : > { %p832_p1 = pneg %p831_p0 }
 0x1d0   : > { %944 = dma.done.wait (%p832_p1), %s648_s10, 128  }
 0x1d1   : > { %946 = vsyncadd (%p832_p1), %s648_s10, 4294967168  ;;  %s19_s23 = sadd.s32 1, %s969_s23   ;;  %s1174_s18 = smov %s953_s19 }
 0x1d2   : > { %p16_p2 = scmp.ge.s32.totalorder %s19_s23, 4   ;;  %s1175_s19 = smov %s957_s20 }
 0x1d3   : > { %s1176_s20 = smov %s1060_s6  ;;  %s1177_s21 = smov %s965_s22 }
 0x1d4   : > { %s1178_s22 = smov %s1180_s26  ;;  %18 = sbr.rel (!%p16_p2) target bundleno = 4 (0x4), region = 97 }
 0x1d9   :  { %653 = vsyncpa [#allocation5], 1 }
 0x1da   :  { %655 = vsyncpa [#allocation5 + $0x1], 1 }

</bundles_post_ra>
